<compile_context>
chip_gen: v7x
topology: tpu7x:2x2x1
jax: 0.10.0
libtpu: 0.0.40
codegen_flags: <defaults>
</compile_context>

<pallas_src>
import functools
import math

import jax
import jax.numpy as jnp
from jax.experimental import pallas as pl
from jax.experimental.pallas import tpu as pltpu


# --------------------------------------------------------------------------
# Kernels
# --------------------------------------------------------------------------

def _ffn_resident_kernel(x_ref, w1_ref, b1_ref, w2_ref, b2_ref, *rest,
                         has_mask, inv_keep, compute_dtype):
    """Fast path: both weight matrices resident in VMEM; rows-only grid."""
    if has_mask:
        mask_ref, o_ref = rest
    else:
        (o_ref,) = rest

    # linear_1 (full d_ff) + bias, f32 accumulation on the MXU.
    h = jnp.dot(x_ref[...], w1_ref[...],
                preferred_element_type=jnp.float32) + b1_ref[...]
    h = jnp.maximum(h, 0.0)                       # relu (VPU, f32)
    if has_mask:
        # dropout: zero dropped elements; 1/(1-p) rescale is applied once on
        # the (row_tile, d_model) output below (linearity), not per element.
        h = h * mask_ref[...].astype(jnp.float32)

    y = jnp.dot(h.astype(compute_dtype), w2_ref[...],
                preferred_element_type=jnp.float32)
    if inv_keep != 1.0:
        y = y * inv_keep
    o_ref[...] = (y + b2_ref[...]).astype(o_ref.dtype)


def _ffn_streamed_kernel(x_ref, w1_ref, b1_ref, w2_ref, b2_ref, *rest,
                         has_mask, inv_keep, compute_dtype, acc_in_out):
    """General path: d_ff is an inner reduction grid axis; weight slabs are
    streamed through VMEM and partial second-matmul results accumulated."""
    if has_mask:
        mask_ref = rest[0]
        rest = rest[1:]
    o_ref = rest[0]
    acc_ref = o_ref if acc_in_out else rest[1]

    k = pl.program_id(1)
    nk = pl.num_programs(1)

    @pl.when(k == 0)
    def _():
        acc_ref[...] = jnp.zeros_like(acc_ref)

    # linear_1 for this d_ff chunk (full contraction over d_model) + bias.
    h = jnp.dot(x_ref[...], w1_ref[...],
                preferred_element_type=jnp.float32) + b1_ref[...]
    h = jnp.maximum(h, 0.0)                       # relu
    if has_mask:
        h = h * mask_ref[...].astype(jnp.float32)  # dropout zeroing only

    # linear_2: partial contraction over this d_ff chunk, f32 accumulation.
    acc_ref[...] += jnp.dot(h.astype(compute_dtype), w2_ref[...],
                            preferred_element_type=jnp.float32)

    @pl.when(k == nk - 1)
    def _():
        y = acc_ref[...]
        if inv_keep != 1.0:
            y = y * inv_keep                      # hoisted dropout rescale
        o_ref[...] = (y + b2_ref[...]).astype(o_ref.dtype)


# --------------------------------------------------------------------------
# Wrapper
# --------------------------------------------------------------------------

def _vmem_capacity_bytes():
    try:
        cap = int(pltpu.get_tpu_info().vmem_capacity_bytes)
        if cap > 0:
            return cap
    except Exception:
        pass
    return 64 << 20   # conservative fallback (v7x per-TensorCore VMEM)


def _pick_ff_tile(d_ff, per_ff_bytes, avail_bytes):
    """Largest multiple of 128 that divides d_ff and fits the VMEM budget."""
    if d_ff % 128 != 0:
        return d_ff
    best = 128
    t = 256
    while t <= d_ff:
        if d_ff % t == 0 and t * per_ff_bytes <= avail_bytes:
            best = t
        t += 128
    return best


def _dropout_keep_mask(seed, shape, dropout_p, dtype):
    """Keep-mask (1.0 = keep, 0.0 = drop) with keep prob (1 - p)."""
    key = jax.random.PRNGKey(seed)
    keep = jax.random.bernoulli(key, 1.0 - float(dropout_p), shape)
    return keep.astype(dtype)


def feed_forward_block(x, w1, b1, w2, b2, *, dropout_p=0.1, train=False,
                       seed=0, row_tile=512, ff_tile=None, compute_dtype=None):
    """x: (B, S, d_model); w1: (d_model, d_ff); w2: (d_ff, d_model).

    row_tile: rows (batch*seq) per grid step.  512 default keeps the kernel
              MXU-bound on v6e (weight-restream intensity ~ row_tile
              flops/byte); v5e is fine from ~256, v7x from ~384.
    ff_tile : d_ff chunk per reduction step.  None = auto-size from the
              device's VMEM capacity (v7x's 64 MiB/TC vs 128 MiB on v5e/v6e).
    compute_dtype: dtype fed to the MXU.  None = bf16 when x is f32
              (accumulation / bias / relu / dropout stay f32).
    """
    B, S, D = x.shape
    d_ff = w1.shape[1]
    M = B * S
    assert 0.0 <= dropout_p < 1.0, "dropout_p must be in [0, 1)"

    if compute_dtype is None:
        compute_dtype = jnp.bfloat16 if x.dtype == jnp.float32 else x.dtype
    compute_dtype = jnp.dtype(compute_dtype)
    it = compute_dtype.itemsize
    out_dtype = x.dtype
    out_it = jnp.dtype(out_dtype).itemsize

    row_tile = min(row_tile, M)
    assert M % row_tile == 0, "batch*seq must be divisible by row_tile"
    # TODO(synk): pad rows / d_ff in the wrapper for non-divisible shapes.

    use_dropout = bool(train) and dropout_p > 0.0
    inv_keep = float(1.0 / (1.0 - dropout_p)) if use_dropout else 1.0

    # Casts are skipped when dtypes already match.  In a training loop,
    # pre-cast the weights to compute_dtype once outside this call to avoid a
    # per-step full HBM read+write of both weight matrices.
    x2 = x.reshape(M, D)
    if x2.dtype != compute_dtype:
        x2 = x2.astype(compute_dtype)
    w1c = w1 if w1.dtype == compute_dtype else w1.astype(compute_dtype)
    w2c = w2 if w2.dtype == compute_dtype else w2.astype(compute_dtype)
    b1_2 = b1.reshape(1, d_ff).astype(jnp.float32)
    b2_2 = b2.reshape(1, D).astype(jnp.float32)

    mask = None
    if use_dropout:
        # TODO(synk): on real TPUs this mask could be generated in-kernel with
        # pltpu.prng_seed / prng_random_bits; the host-side jax.random mask is
        # used so the kernel also runs under interpret mode (no TPU PRNG on
        # CPU) and so training results are tiling-independent.
        mask = _dropout_keep_mask(seed, (M, d_ff), dropout_p, compute_dtype)

    vmem_cap = _vmem_capacity_bytes()
    n_row_tiles = M // row_tile
    weight_bytes = (w1c.size + w2c.size) * it
    hidden_full_bytes = row_tile * d_ff * 4
    flops = 4 * M * D * d_ff            # two matmuls, 2*M*D*d_ff flops each

    # Resident-weight fast path: weights DMA'd once per kernel invocation
    # (constant block index), no reduction axis, no accumulator scratch.
    resident = ((ff_tile is None or ff_tile >= d_ff)
                and (2 * weight_bytes + hidden_full_bytes)
                <= min(8 << 20, vmem_cap // 4))

    if resident:
        grid = (n_row_tiles,)
        in_specs = [
            pl.BlockSpec((row_tile, D), lambda i: (i, 0)),   # x rows
            pl.BlockSpec((D, d_ff), lambda i: (0, 0)),       # W1 (resident)
            pl.BlockSpec((1, d_ff), lambda i: (0, 0)),       # b1
            pl.BlockSpec((d_ff, D), lambda i: (0, 0)),       # W2 (resident)
            pl.BlockSpec((1, D), lambda i: (0, 0)),          # b2
        ]
        args = [x2, w1c, b1_2, w2c, b2_2]
        if use_dropout:
            in_specs.append(pl.BlockSpec((row_tile, d_ff), lambda i: (i, 0)))
            args.append(mask)
        out_specs = pl.BlockSpec((row_tile, D), lambda i: (i, 0))
        scratch_shapes = []
        kernel = functools.partial(_ffn_resident_kernel,
                                   has_mask=use_dropout, inv_keep=inv_keep,
                                   compute_dtype=compute_dtype)
        dim_sem = ("parallel",)

        footprint = 2 * (row_tile * D * it + D * d_ff * it + d_ff * 4
                         + d_ff * D * it + D * 4 + row_tile * D * out_it)
        footprint += hidden_full_bytes
        if use_dropout:
            footprint += 2 * row_tile * d_ff * it
        bytes_accessed = (x2.size * it + weight_bytes
                          + b1_2.size * 4 + b2_2.size * 4 + M * D * out_it
                          + (mask.size * it if use_dropout else 0))
    else:
        if ff_tile is None:
            # Auto-size ff_tile from the device VMEM budget.
            budget = int(vmem_cap * 0.8)
            fixed = 2 * (row_tile * D * it + D * 4 + row_tile * D * out_it)
            fixed += row_tile * D * 4                       # accumulator
            per_ff = 2 * (2 * D * it + 4) + row_tile * 4    # W slabs + b1 + h
            if use_dropout:
                per_ff += 2 * row_tile * it
            avail = max(budget - fixed, per_ff * 128)
            ff_tile = _pick_ff_tile(d_ff, per_ff, avail)
        ff_tile = min(ff_tile, d_ff)
        assert d_ff % ff_tile == 0, "d_ff must be divisible by ff_tile"
        nk = d_ff // ff_tile

        # f32 output -> accumulate straight into o_ref (saves VMEM on v7x).
        acc_in_out = jnp.dtype(out_dtype) == jnp.float32

        grid = (n_row_tiles, nk)
        in_specs = [
            pl.BlockSpec((row_tile, D), lambda i, k: (i, 0)),   # x rows
            pl.BlockSpec((D, ff_tile), lambda i, k: (0, k)),    # W1 slab
            pl.BlockSpec((1, ff_tile), lambda i, k: (0, k)),    # b1 chunk
            pl.BlockSpec((ff_tile, D), lambda i, k: (k, 0)),    # W2 slab
            pl.BlockSpec((1, D), lambda i, k: (0, 0)),          # b2
        ]
        args = [x2, w1c, b1_2, w2c, b2_2]
        if use_dropout:
            in_specs.append(pl.BlockSpec((row_tile, ff_tile),
                                         lambda i, k: (i, k)))
            args.append(mask)
        out_specs = pl.BlockSpec((row_tile, D), lambda i, k: (i, 0))
        scratch_shapes = ([] if acc_in_out
                          else [pltpu.VMEM((row_tile, D), jnp.float32)])
        kernel = functools.partial(_ffn_streamed_kernel,
                                   has_mask=use_dropout, inv_keep=inv_keep,
                                   compute_dtype=compute_dtype,
                                   acc_in_out=acc_in_out)
        dim_sem = ("parallel", "arbitrary")

        footprint = 2 * (row_tile * D * it + D * ff_tile * it + ff_tile * 4
                         + ff_tile * D * it + D * 4 + row_tile * D * out_it)
        footprint += row_tile * ff_tile * 4                  # hidden chunk
        if not acc_in_out:
            footprint += row_tile * D * 4                    # acc scratch
        if use_dropout:
            footprint += 2 * row_tile * ff_tile * it
        # Weight slabs (and bias chunks) are re-streamed once per row tile.
        bytes_accessed = (x2.size * it + M * D * out_it
                          + n_row_tiles * (weight_bytes
                                           + b1_2.size * 4 + b2_2.size * 4)
                          + (mask.size * it if use_dropout else 0))

    vmem_limit = int(min(max(int(footprint * 1.3) + (4 << 20), 32 << 20),
                         vmem_cap - (8 << 20)))

    out2 = pl.pallas_call(
        kernel,
        out_shape=jax.ShapeDtypeStruct((M, D), out_dtype),
        grid_spec=pltpu.PrefetchScalarGridSpec(
            num_scalar_prefetch=0,
            grid=grid,
            in_specs=in_specs,
            out_specs=out_specs,
            scratch_shapes=scratch_shapes),
        compiler_params=pltpu.CompilerParams(
            dimension_semantics=dim_sem,
            vmem_limit_bytes=vmem_limit),
        cost_estimate=pl.CostEstimate(flops=int(flops), transcendentals=0,
                                      bytes_accessed=int(bytes_accessed)),
    )(*args)

    return out2.reshape(B, S, D)


# --------------------------------------------------------------------------
# Demo / self-test
# --------------------------------------------------------------------------

def _init_params(key, d_model, d_ff, dtype=jnp.float32):
    """PyTorch-Linear-like init (uniform +/- 1/sqrt(fan_in)).

    Weights are stored pre-transposed as (in, out) so the kernel computes x @ W.
    """
    k1, k2, k3, k4 = jax.random.split(key, 4)
    lim1 = 1.0 / math.sqrt(d_model)
    lim2 = 1.0 / math.sqrt(d_ff)
    w1 = jax.random.uniform(k1, (d_model, d_ff), dtype, -lim1, lim1)
    b1 = jax.random.uniform(k2, (d_ff,), dtype, -lim1, lim1)
    w2 = jax.random.uniform(k3, (d_ff, d_model), dtype, -lim2, lim2)
    b2 = jax.random.uniform(k4, (d_model,), dtype, -lim2, lim2)
    return w1, b1, w2, b2


if __name__ == "__main__":
    # Small shapes implied by the module: (batch, seq, d_model), d_ff = 8*d_model.
    batch, seq, d_model, d_ff = 2, 8, 32, 256
    dropout_p = 0.1

    key = jax.random.PRNGKey(0)
    kx, kp = jax.random.split(key)
    x = jax.random.normal(kx, (batch, seq, d_model), jnp.float32)
    w1, b1, w2, b2 = _init_params(kp, d_model, d_ff)

    # Pure-JAX reference (eval mode: dropout is identity, matching module.eval()).
    h_ref = jnp.maximum(x @ w1 + b1, 0.0)
    y_ref = h_ref @ w2 + b2

    # 1) Eval mode, resident-weight fast path, f32 MXU inputs (tight check).
    y = feed_forward_block(x, w1, b1, w2, b2, dropout_p=dropout_p, train=False,
                           compute_dtype=jnp.float32)
    y = jax.block_until_ready(y)
    assert y.shape == (batch, seq, d_model)
    assert jnp.allclose(y, y_ref, atol=1e-5, rtol=1e-5)

    # 2) Eval mode, streamed d_ff-reduction path (ff_tile=128 -> 2 chunks), f32.
    y2 = feed_forward_block(x, w1, b1, w2, b2, dropout_p=dropout_p, train=False,
                            compute_dtype=jnp.float32, ff_tile=128)
    y2 = jax.block_until_ready(y2)
    assert jnp.allclose(y2, y_ref, atol=1e-5, rtol=1e-5)

    # 3) Eval mode, default compute dtype (bf16 MXU inputs, f32 accumulation).
    y3 = feed_forward_block(x, w1, b1, w2, b2, dropout_p=dropout_p, train=False)
    y3 = jax.block_until_ready(y3)
    assert jnp.allclose(y3, y_ref, atol=5e-2, rtol=5e-2)

    # 4) Training mode (dropout active) on the streamed path; checked against
    #    a pure-JAX reference built from the exact same keep-mask.
    seed = 123
    mask_full = _dropout_keep_mask(seed, (batch * seq, d_ff), dropout_p,
                                   jnp.float32)
    h_keep = h_ref.reshape(batch * seq, d_ff) * mask_full
    y_train_ref = ((h_keep / (1.0 - dropout_p)) @ w2 + b2
                   ).reshape(batch, seq, d_model)
    yt = feed_forward_block(x, w1, b1, w2, b2, dropout_p=dropout_p, train=True,
                            seed=seed, compute_dtype=jnp.float32, ff_tile=128)
    yt = jax.block_until_ready(yt)
    assert yt.shape == (batch, seq, d_model)
    assert jnp.allclose(yt, y_train_ref, atol=1e-5, rtol=1e-5)

    print("KERNEL_OK")
</pallas_src>

<mosaic_0001>
module attributes {stable_mosaic.version = 11 : i64} {
  func.func @_ffn_resident_kernel(%arg0: i32, %arg1: memref<16x32xf32, #tpu.memory_space<vmem>>, %arg2: memref<32x256xf32, #tpu.memory_space<vmem>>, %arg3: memref<1x256xf32, #tpu.memory_space<vmem>>, %arg4: memref<256x32xf32, #tpu.memory_space<vmem>>, %arg5: memref<1x32xf32, #tpu.memory_space<vmem>>, %arg6: memref<16x32xf32, #tpu.memory_space<vmem>>) attributes {dimension_semantics = [#tpu.dimension_semantics<parallel>], iteration_bounds = array<i64: 1>, scalar_prefetch = 0 : i64, scratch_operands = 0 : i64, tpu.core_type = #tpu.core_type<tc>, window_params = [{transform_indices = @transform_0, window_bounds = array<i64: 16, 32>}, {pipeline_mode = #tpu.pipeline_mode<synchronous>, transform_indices = @transform_1, window_bounds = array<i64: 32, 256>}, {pipeline_mode = #tpu.pipeline_mode<synchronous>, transform_indices = @transform_2, window_bounds = array<i64: 1, 256>}, {pipeline_mode = #tpu.pipeline_mode<synchronous>, transform_indices = @transform_3, window_bounds = array<i64: 256, 32>}, {pipeline_mode = #tpu.pipeline_mode<synchronous>, transform_indices = @transform_4, window_bounds = array<i64: 1, 32>}, {transform_indices = @transform_5, window_bounds = array<i64: 16, 32>}]} {
    %c0 = arith.constant 0 : index
    %c0_0 = arith.constant 0 : index
    %0 = vector.load %arg1[%c0, %c0_0] : memref<16x32xf32, #tpu.memory_space<vmem>>, vector<16x32xf32>
    %c0_1 = arith.constant 0 : index
    %c0_2 = arith.constant 0 : index
    %1 = vector.load %arg2[%c0_1, %c0_2] : memref<32x256xf32, #tpu.memory_space<vmem>>, vector<32x256xf32>
    %cst = arith.constant dense<0.000000e+00> : vector<16x256xf32>
    %2 = tpu.matmul %0, %1, %cst {dimension_numbers = #tpu.dot_dimension_numbers<[1], [0], [0], [1], [0, 0, 1, 1], [], []>} : vector<16x32xf32>, vector<32x256xf32>, vector<16x256xf32> -> vector<16x256xf32>
    %c0_3 = arith.constant 0 : index
    %c0_4 = arith.constant 0 : index
    %3 = vector.load %arg3[%c0_3, %c0_4] : memref<1x256xf32, #tpu.memory_space<vmem>>, vector<1x256xf32>
    %4 = vector.broadcast %3 : vector<1x256xf32> to vector<16x256xf32>
    %5 = arith.addf %2, %4 : vector<16x256xf32>
    %cst_5 = arith.constant 0.000000e+00 : f32
    %6 = vector.broadcast %cst_5 : f32 to vector<16x256xf32>
    %7 = arith.maximumf %5, %6 : vector<16x256xf32>
    %c0_6 = arith.constant 0 : index
    %c0_7 = arith.constant 0 : index
    %8 = vector.load %arg4[%c0_6, %c0_7] : memref<256x32xf32, #tpu.memory_space<vmem>>, vector<256x32xf32>
    %cst_8 = arith.constant dense<0.000000e+00> : vector<16x32xf32>
    %9 = tpu.matmul %7, %8, %cst_8 {dimension_numbers = #tpu.dot_dimension_numbers<[1], [0], [0], [1], [0, 0, 1, 1], [], []>} : vector<16x256xf32>, vector<256x32xf32>, vector<16x32xf32> -> vector<16x32xf32>
    %c0_9 = arith.constant 0 : index
    %c0_10 = arith.constant 0 : index
    %10 = vector.load %arg5[%c0_9, %c0_10] : memref<1x32xf32, #tpu.memory_space<vmem>>, vector<1x32xf32>
    %11 = vector.broadcast %10 : vector<1x32xf32> to vector<16x32xf32>
    %12 = arith.addf %9, %11 : vector<16x32xf32>
    %c0_11 = arith.constant 0 : index
    %c0_12 = arith.constant 0 : index
    %13 = vector.load %arg6[%c0_11, %c0_12] : memref<16x32xf32, #tpu.memory_space<vmem>>, vector<16x32xf32>
    tpu.vector_store %arg6[%c0_11, %c0_12], %12 {strides = array<i32>} : memref<16x32xf32, #tpu.memory_space<vmem>>, vector<16x32xf32>,
    return
  }
  func.func @transform_0(%arg0: i32) -> (i32, i32) {
    %c0_i32 = arith.constant 0 : i32
    %c0_i32_0 = arith.constant 0 : i32
    return %arg0, %c0_i32 : i32, i32
  }
  func.func @transform_1(%arg0: i32) -> (i32, i32) {
    %c0_i32 = arith.constant 0 : i32
    %c0_i32_0 = arith.constant 0 : i32
    %c0_i32_1 = arith.constant 0 : i32
    return %c0_i32, %c0_i32_0 : i32, i32
  }
  func.func @transform_2(%arg0: i32) -> (i32, i32) {
    %c0_i32 = arith.constant 0 : i32
    %c0_i32_0 = arith.constant 0 : i32
    %c0_i32_1 = arith.constant 0 : i32
    return %c0_i32, %c0_i32_0 : i32, i32
  }
  func.func @transform_3(%arg0: i32) -> (i32, i32) {
    %c0_i32 = arith.constant 0 : i32
    %c0_i32_0 = arith.constant 0 : i32
    %c0_i32_1 = arith.constant 0 : i32
    return %c0_i32, %c0_i32_0 : i32, i32
  }
  func.func @transform_4(%arg0: i32) -> (i32, i32) {
    %c0_i32 = arith.constant 0 : i32
    %c0_i32_0 = arith.constant 0 : i32
    %c0_i32_1 = arith.constant 0 : i32
    return %c0_i32, %c0_i32_0 : i32, i32
  }
  func.func @transform_5(%arg0: i32) -> (i32, i32) {
    %c0_i32 = arith.constant 0 : i32
    %c0_i32_0 = arith.constant 0 : i32
    return %arg0, %c0_i32 : i32, i32
  }
}

</mosaic_0001>

<bundles_post_ra>
// kernel: tpu_custom_call.1
= control target key start
LH: loop header
LB: loop body
LE: loop exit
PB: predicated region body
PF: predicated region fallthrough
CT: control target
= control target key end

     0   :  { %v372_v7 = vmov 0.0   ;;  %vm43_vm0 = vcmask 261120   ;;  %s554_s0 = inlined_call_operand.vmem [shape: f32[16,32], index: 0, kind: input, shape index: {}]   ;;  %s555_s1 = inlined_call_operand.vmem [shape: f32[32,256], index: 1, kind: input, shape index: {}]   ;;  %s556_s2 = inlined_call_operand.vmem [shape: f32[1,256], index: 2, kind: input, shape index: {}]   ;;  %s557_s3 = inlined_call_operand.vmem [shape: f32[256,32], index: 3, kind: input, shape index: {}]   ;;  %s558_s4 = inlined_call_operand.vmem [shape: f32[1,32], index: 4, kind: input, shape index: {}]   ;;  %s559_s5 = inlined_call_operand.hbm [shape: f32[16,32], index: 5, kind: output, shape index: {}]  }
   0x1   :  { %v24_v0 = vld [vmem:[%s555_s1 + $0x8] sm:$0xff]  ;;  %v26_v1 = vld [vmem:[%s555_s1 + $0x18] sm:$0xff]  ;;  %v23_v2 = vld [vmem:[%s555_s1] sm:$0xff]  ;;  %114 = vmatprep.mubr.f32.mxu0 %v372_v7 }
   0x2   :  { %v304_v3 = vpack.c.bf16 %v26_v1, %v24_v0  ;;  %v25_v4 = vld [vmem:[%s555_s1 + $0x10] sm:$0xff]  ;;  %v28_v5 = vld [vmem:[%s555_s1 + $0x28] sm:$0xff]  ;;  %v30_v6 = vld [vmem:[%s555_s1 + $0x38] sm:$0xff] }
   0x3   :  { %v306_v8 = vpack.c.bf16 %v25_v4, %v23_v2  ;;  %v308_v9 = vpack.c.bf16 %v30_v6, %v28_v5  ;;  %v27_v10 = vld [vmem:[%s555_s1 + $0x20] sm:$0xff]  ;;  %v29_v11 = vld [vmem:[%s555_s1 + $0x30] sm:$0xff]  ;;  %v148_v13 = vld [vmem:[%s557_s3 + $0x88] sm:$0xff] }
   0x4   :  { %305 = vmatprep.subr.bf16.mxu0 %v304_v3  ;;  %v147_v12 = vld [vmem:[%s557_s3 + $0x80] sm:$0xff]  ;;  %v310_v14 = vpack.c.bf16 %v29_v11, %v27_v10  ;;  %v132_v17 = vld [vmem:[%s557_s3 + $0x8] sm:$0xff]  ;;  %v149_v18 = vld [vmem:[%s557_s3 + $0x90] sm:$0xff] }
   0x5   :  { %307 = vmatpush1.bf16.msra.mxu0 %v306_v8  ;;  %v312_v15 = vpack.c.bf16 %v148_v13, %v147_v12  ;;  %v131_v16 = vld [vmem:[%s557_s3] sm:$0xff]  ;;  %v150_v20 = vld [vmem:[%s557_s3 + $0x98] sm:$0xff]  ;;  %v133_v21 = vld [vmem:[%s557_s3 + $0x10] sm:$0xff] }
   0x6   :  { %309 = vmatprep.subr.bf16.mxu0 %v308_v9  ;;  %v314_v19 = vpack.c.bf16 %v132_v17, %v131_v16  ;;  %v134_v22 = vld [vmem:[%s557_s3 + $0x18] sm:$0xff]  ;;  %v316_v23 = vpack.c.bf16 %v150_v20, %v149_v18  ;;  %v151_v24 = vld [vmem:[%s557_s3 + $0xa0] sm:$0xff]  ;;  %v152_v25 = vld [vmem:[%s557_s3 + $0xa8] sm:$0xff] }
   0x7   :  { %313 = vmatprep.subr.bf16.mxu1 %v312_v15  ;;  %v318_v26 = vpack.c.bf16 %v134_v22, %v133_v21  ;;  %v21_v27 = vld [vmem:[%s554_s0] sm:$0xff]  ;;  %v320_v28 = vpack.c.bf16 %v152_v25, %v151_v24  ;;  %v136_v30 = vld [vmem:[%s557_s3 + $0x28] sm:$0xff]  ;;  %v153_v31 = vld [vmem:[%s557_s3 + $0xb0] sm:$0xff] }
   0x8   :  { %315 = vmatpush3.bf16.msra.mxu1 %v314_v19  ;;  %v135_v29 = vld [vmem:[%s557_s3 + $0x20] sm:$0xff]  ;;  %v154_v32 = vld [vmem:[%s557_s3 + $0xb8] sm:$0xff]  ;;  %v22_v33 = vld [vmem:[%s554_s0 + $0x8] sm:$0xff] }
   0x9   :  { %311 = vmatpush1.bf16.msra.mxu0 %v310_v14  ;;  %317 = vmatprep.subr.bf16.mxu1 %v316_v23  ;;  %v322_v34 = vpack.c.bf16 %v136_v30, %v135_v29  ;;  %v324_v35 = vpack.c.bf16 %v154_v32, %v153_v31  ;;  %v137_v36 = vld [vmem:[%s557_s3 + $0x30] sm:$0xff]  ;;  %v138_v37 = vld [vmem:[%s557_s3 + $0x38] sm:$0xff] }
   0xc   :  { %263 = vmatmul.mubr.msk.f32.vlgmr.msra.gmra.mrb[0].mxu0 %vm43_vm0, %v21_v27  ;;  %319 = vmatpush3.bf16.msra.mxu1 %v318_v26 }
   0xd   :  { %120 = vmatprep.mubr.f32.mxu0 %v372_v7  ;;  %321 = vmatprep.subr.bf16.mxu1 %v320_v28 }
   0xe   :  { %10 = vsyncpa [#allocation3], 0  ;;  %v155_v38 = vld [vmem:[%s557_s3 + $0xc0] sm:$0xff]  ;;  %v156_v39 = vld [vmem:[%s557_s3 + $0xc8] sm:$0xff]  ;;  %v326_v40 = vpack.c.bf16 %v138_v37, %v137_v36  ;;  %v33_v63 = vlaneseq  ;;  %s373_s24 = smov [#allocation2]  }
   0xf   :  { %v328_v41 = vpack.c.bf16 %v156_v39, %v155_v38  ;;  %v139_v42 = vld [vmem:[%s557_s3 + $0x40] sm:$0xff]  ;;  %v140_v43 = vld [vmem:[%s557_s3 + $0x48] sm:$0xff]  ;;  %v157_v44 = vld [vmem:[%s557_s3 + $0xd0] sm:$0xff]  ;;  %s252_s25 = sshll.u32 %s373_s24, 4  ;;  %s253_s25 = int_to_ptr.vmem [resolvable:$true] %s252_s25 }
  0x10   :  { %264 = vmatmul.mubr.msk.f32.gmra.mrb[2].mxu0 %vm43_vm0, %v22_v33  ;;  %323 = vmatpush3.bf16.msra.mxu1 %v322_v34  ;;  %v158_v45 = vld [vmem:[%s557_s3 + $0xd8] sm:$0xff]  ;;  %v330_v46 = vpack.c.bf16 %v140_v43, %v139_v42  ;;  %v141_v48 = vld [vmem:[%s557_s3 + $0x50] sm:$0xff]  ;;  %v159_v50 = vld [vmem:[%s557_s3 + $0xe0] sm:$0xff]  ;;  %v34_v0 = vshrl.u32 %v33_v63, 7  ;;  %s348_s26 = scalar_lea.vmem %s253_s25, 256  ;;  %p353_p1 = scmp.lt.s32.totalorder %s253_s25, %s253_s25 }
  0x11   :  { %325 = vmatprep.subr.bf16.mxu1 %v324_v35  ;;  %v332_v47 = vpack.c.bf16 %v158_v45, %v157_v44  ;;  %v142_v49 = vld [vmem:[%s557_s3 + $0x58] sm:$0xff]  ;;  %v160_v51 = vld [vmem:[%s557_s3 + $0xe8] sm:$0xff]  ;;  %v143_v54 = vld [vmem:[%s557_s3 + $0x60] sm:$0xff]  ;;  %p349_p0 = scmp.ne.s32.totalorder %s253_s25, %s348_s26  ;;  %p354_p2 = scmp.lt.s32.totalorder %s348_s26, %s348_s26 }
  0x12   :  { %v334_v52 = vpack.c.bf16 %v142_v49, %v141_v48  ;;  %v336_v53 = vpack.c.bf16 %v160_v51, %v159_v50  ;;  %v144_v55 = vld [vmem:[%s557_s3 + $0x68] sm:$0xff]  ;;  %v161_v57 = vld [vmem:[%s557_s3 + $0xf0] sm:$0xff]  ;;  %v162_v58 = vld [vmem:[%s557_s3 + $0xf8] sm:$0xff]  ;;  %v35_v1 = vsub.s32 0, %v34_v0  ;;  %v39_v3 = vsub.s32 1, %v34_v0 }
  0x13   :  { %v338_v56 = vpack.c.bf16 %v144_v55, %v143_v54  ;;  %v340_v59 = vpack.c.bf16 %v162_v58, %v161_v57  ;;  %v145_v60 = vld [vmem:[%s557_s3 + $0x70] sm:$0xff]  ;;  %v146_v61 = vld [vmem:[%s557_s3 + $0x78] sm:$0xff]  ;;  %v31_v2 = vld [vmem:[%s556_s2] sm:$0x3]  ;;  %p355_p3 = por %p354_p2, %p353_p1 }
  0x14   :  { %327 = vmatpush3.bf16.msra.mxu1 %v326_v40  ;;  %v342_v62 = vpack.c.bf16 %v146_v61, %v145_v60  ;;  %v36_v4 = vrot.slane %v31_v2, %v35_v1  ;;  %v40_v5 = vrot.slane %v31_v2, %v39_v3  ;;  %v265_v19 = vld [vmem:[%s558_s4] ss:$0 sm:$0xff] }
  0x15   :  { %329 = vmatprep.subr.bf16.mxu1 %v328_v41  ;;  %p356_p4 = pnand %p355_p3, %p349_p0 }
  0x18   :  { %331 = vmatpush3.bf16.msra.mxu1 %v330_v46 }
  0x19   :  { %333 = vmatprep.subr.bf16.mxu1 %v332_v47 }
  0x1c   :  { %335 = vmatpush3.bf16.msra.mxu1 %v334_v52 }
  0x1d   :  { %337 = vmatprep.subr.bf16.mxu1 %v336_v53 }
  0x20   :  { %339 = vmatpush3.bf16.msra.mxu1 %v338_v56 }
  0x21   :  { %341 = vmatprep.subr.bf16.mxu1 %v340_v59 }
  0x24   :  { %343 = vmatpush3.bf16.msra.mxu1 %v342_v62 }
  0xdf   :  { %v116_v6 = vpop.f32.mrb[0].mxu0 }
  0xe0   :  { %v117_v7 = vadd.f32 %v116_v6, %v36_v4  ;;  %v118_v8 = vpop.f32.mrb[1].mxu0 }
  0xe1   :  { %v119_v9 = vadd.f32 %v118_v8, %v40_v5 }
  0xe2   :  { %v127_v12 = vmax.f32 %v117_v7, 0.0 }
  0xe3   :  { %v122_v10 = vpop.f32.mrb[2].mxu0  ;;  %v128_v11 = vmax.f32 %v119_v9, 0.0 }
  0xe4   :  { %v123_v13 = vadd.f32 %v122_v10, %v36_v4  ;;  %v124_v14 = vpop.f32.mrb[3].mxu0 }
  0xe5   :  { %v125_v15 = vadd.f32 %v124_v14, %v40_v5  ;;  %234 = vmatprep.mubr.f32.mxu1 %v128_v11 }
  0xe6   :  { %235 = vmatmul.mubr.f32.vlgmr.msra.gmra.mrb[0].mxu1 %v127_v12  ;;  %v129_v17 = vmax.f32 %v123_v13, 0.0 }
  0xe7   :  { %v130_v16 = vmax.f32 %v125_v15, 0.0 }
  0xe9   :  { %239 = vmatprep.mubr.f32.mxu1 %v130_v16 }
  0xea   :  { %240 = vmatmul.mubr.f32.gmra.mrb[2].mxu1 %v129_v17 }
 0x1b9   :  { %v298_v18 = vpop.f32.mrb[0].mxu1 }
 0x1ba   :  { %v299_v20 = vpop.f32.mrb[1].mxu1 }
 0x1bb   :  { %v300_v21 = vadd.f32 %v299_v20, %v298_v18 }
 0x1bd   :  { %v237_v22 = vadd.f32 %v300_v21, %v265_v19  ;;  %v301_v23 = vpop.f32.mrb[2].mxu1 }
 0x1be   :  { %v302_v24 = vpop.f32.mrb[3].mxu1 }
 0x1bf   :  { %245 = vst.msk [vmem:[#allocation2] sm:$0xff] %vm43_vm0, %v237_v22  ;;  %v303_v25 = vadd.f32 %v302_v24, %v301_v23 }
 0x1c1   :  { %v242_v26 = vadd.f32 %v303_v25, %v265_v19 }
 0x1c3   :  { %246 = vst.msk [vmem:[#allocation2 + $0x8] sm:$0xff] %vm43_vm0, %v242_v26 }
 0x1c4   :  { %359 = shalt.err (!%p356_p4)
}
 0x1c5   :  { %s360_s28 = scalar_lea.hbm %s559_s5, 256 }
 0x1c6   :  { %p361_p5 = scmp.ne.s32.totalorder %s559_s5, %s360_s28  ;;  %p364_p6 = scmp.lt.u32.totalorder %s360_s28, %s559_s5 }
 0x1c8   :  { %p366_p7 = pnand %p364_p6, %p361_p5 }
 0x1ca   :  { %369 = shalt.err (!%p366_p7)
}
 0x1cb   :  { %s374_s8 = smov 128   ;;  %s375_s9 = smov 8  }
 0x1cc   :  { %258 = dma.vmem_to_hbm [thread:$0]  %s253_s25, 256, %s559_s5, [#allocation3], %s374_s8, %s374_s8, %s375_s9  }
 0x1cd   :  { %370 = dma.done.wait [#allocation3], 256  }
 0x1ce   :  { %371 = vsyncadd [#allocation3], 4294967040 }
 0x1cf   :  { %262 = vsyncpa [#allocation3], 1 }

</bundles_post_ra>
